<compile_context>
chip_gen: v5e
topology: v5e:2x2
jax: 0.10.0
libtpu: 0.0.40
codegen_flags: <defaults>
</compile_context>

<pallas_src>
import functools

import jax
import jax.numpy as jnp
from jax.experimental import pallas as pl
from jax.experimental.pallas import tpu as pltpu

HIDDEN = 75          # as in the PyTorch module: Linear(in_size, 75) -> Linear(75, out_size)
HIDDEN_PAD = 128     # lane-aligned hidden width (zero-padded; math is identical)
LANE = 128


def _round_up(x, m):
    return (x + m - 1) // m * m


def mlp_kernel(x_ref, w1_ref, b1_ref, w2_ref, b2_ref, o_ref):
    # One (tile_n, in_size) row tile of x; weights/biases are resident across the grid.
    x = x_ref[...]                                                      # (tile_n, in_size) bf16/f32
    # First matmul: MXU with f32 accumulation; bias add + ReLU on the VPU in f32.
    h = jnp.dot(x, w1_ref[...], preferred_element_type=jnp.float32)     # (tile_n, 128) f32
    h = jnp.maximum(h + b1_ref[...], 0.0)
    # Second matmul: cast the activation to the weight dtype (bf16) for the MXU,
    # accumulate in f32, add bias in f32.
    y = jnp.dot(h.astype(w2_ref.dtype), w2_ref[...],
                preferred_element_type=jnp.float32) + b2_ref[...]        # (tile_n, out_pad) f32
    o_ref[...] = y.astype(o_ref.dtype)


@functools.partial(jax.jit, static_argnames=("tile_n", "use_bf16"))
def neuralnet_forward(x, w1, b1, w2, b2, *, tile_n=512, use_bf16=True):
    """Forward pass of NeuralNet (part 1): Linear(in, 75) -> ReLU -> Linear(75, out).

    x  : (N, in_size) float32
    w1 : (in_size, 75) float32   (== torch linear1.weight.T)
    b1 : (1, 75) float32
    w2 : (75, out_size) float32  (== torch linear2.weight.T)
    b2 : (1, out_size) float32
    returns (N, out_size) float32
    """
    n, in_size = x.shape
    out_size = w2.shape[1]

    # --- layout padding (all zero padding; contributes exactly 0 through ReLU/matmul) ---
    out_pad = _round_up(out_size, LANE)
    w1p = jnp.zeros((in_size, HIDDEN_PAD), jnp.float32).at[:, :HIDDEN].set(w1)
    b1p = jnp.zeros((1, HIDDEN_PAD), jnp.float32).at[:, :HIDDEN].set(b1)
    w2p = jnp.zeros((HIDDEN_PAD, out_pad), jnp.float32).at[:HIDDEN, :out_size].set(w2)
    b2p = jnp.zeros((1, out_pad), jnp.float32).at[:, :out_size].set(b2)

    # --- batch tiling: tile_n multiple of 8 (sublane), N padded to a multiple of it ---
    tile_n = max(8, min(tile_n, _round_up(n, 8)))
    tile_n = _round_up(tile_n, 8)
    n_pad = _round_up(n, tile_n)
    xp = jnp.zeros((n_pad, in_size), jnp.float32).at[:n, :].set(x)

    # --- matmul operands in bf16 (halves x HBM traffic, bf16 MXU rate); biases stay f32 ---
    mm_dtype = jnp.bfloat16 if use_bf16 else jnp.float32
    xc = xp.astype(mm_dtype)
    w1c = w1p.astype(mm_dtype)
    w2c = w2p.astype(mm_dtype)

    grid = (n_pad // tile_n,)
    itemsize = jnp.dtype(mm_dtype).itemsize
    cost = pl.CostEstimate(
        flops=2 * n_pad * in_size * HIDDEN_PAD + 2 * n_pad * HIDDEN_PAD * out_pad,
        transcendentals=0,
        bytes_accessed=(n_pad * in_size * itemsize
                        + in_size * HIDDEN_PAD * itemsize
                        + HIDDEN_PAD * out_pad * itemsize
                        + (HIDDEN_PAD + out_pad) * 4
                        + n_pad * out_pad * 4),
    )

    out = pl.pallas_call(
        mlp_kernel,
        out_shape=jax.ShapeDtypeStruct((n_pad, out_pad), jnp.float32),
        grid=grid,
        in_specs=[
            pl.BlockSpec((tile_n, in_size), lambda i: (i, 0)),       # streamed x tile
            pl.BlockSpec((in_size, HIDDEN_PAD), lambda i: (0, 0)),   # resident W1
            pl.BlockSpec((1, HIDDEN_PAD), lambda i: (0, 0)),         # resident b1 (f32)
            pl.BlockSpec((HIDDEN_PAD, out_pad), lambda i: (0, 0)),   # resident W2
            pl.BlockSpec((1, out_pad), lambda i: (0, 0)),            # resident b2 (f32)
        ],
        out_specs=pl.BlockSpec((tile_n, out_pad), lambda i: (i, 0)),  # lane-dense y tile
        compiler_params=pltpu.CompilerParams(
            dimension_semantics=("parallel",),       # shard row tiles across v7x's 2 TCs
            vmem_limit_bytes=48 * 1024 * 1024,        # explicit, fits v7x's 64 MiB VMEM
        ),
        cost_estimate=cost,
    )(xc, w1c, b1p, w2c, b2p)

    # Slice away batch / lane padding.
    return out[:n, :out_size]


def init_params(key, in_size, out_size):
    """Deterministic Kaiming-uniform-ish init matching torch.nn.Linear shapes."""
    k1, k2, k3, k4 = jax.random.split(key, 4)
    bound1 = 1.0 / jnp.sqrt(in_size)
    bound2 = 1.0 / jnp.sqrt(HIDDEN)
    w1 = jax.random.uniform(k1, (in_size, HIDDEN), jnp.float32, -bound1, bound1)
    b1 = jax.random.uniform(k2, (1, HIDDEN), jnp.float32, -bound1, bound1)
    w2 = jax.random.uniform(k3, (HIDDEN, out_size), jnp.float32, -bound2, bound2)
    b2 = jax.random.uniform(k4, (1, out_size), jnp.float32, -bound2, bound2)
    return w1, b1, w2, b2


if __name__ == "__main__":
    key = jax.random.PRNGKey(0)
    kx, kp = jax.random.split(key)

    # Small shapes; N deliberately not a multiple of 8 to exercise batch padding.
    N, in_size, out_size = 10, 32, 10
    x = jax.random.normal(kx, (N, in_size), jnp.float32)
    w1, b1, w2, b2 = init_params(kp, in_size, out_size)

    y = neuralnet_forward(x, w1, b1, w2, b2)
    y = jax.block_until_ready(y)
    assert y.shape == (N, out_size)

    # Reference with the same bf16-matmul / f32-accumulate recipe as the kernel.
    xb, w1b, w2b = x.astype(jnp.bfloat16), w1.astype(jnp.bfloat16), w2.astype(jnp.bfloat16)
    h_ref = jnp.maximum(jnp.dot(xb, w1b, preferred_element_type=jnp.float32) + b1, 0.0)
    y_ref = jnp.dot(h_ref.astype(jnp.bfloat16), w2b,
                    preferred_element_type=jnp.float32) + b2
    assert jnp.allclose(y, y_ref, atol=2e-2, rtol=2e-2)

    # Sanity vs. pure-f32 math (bf16 rounding only).
    y_f32 = jnp.maximum(x @ w1 + b1, 0.0) @ w2 + b2
    assert jnp.allclose(y, y_f32, atol=5e-2, rtol=5e-2)

    print("KERNEL_OK")
</pallas_src>

<mosaic_0001>
module attributes {stable_mosaic.version = 11 : i64} {
  func.func @mlp_kernel(%arg0: i32, %arg1: memref<16x32xbf16, #tpu.memory_space<vmem>>, %arg2: memref<32x128xbf16, #tpu.memory_space<vmem>>, %arg3: memref<1x128xf32, #tpu.memory_space<vmem>>, %arg4: memref<128x128xbf16, #tpu.memory_space<vmem>>, %arg5: memref<1x128xf32, #tpu.memory_space<vmem>>, %arg6: memref<16x128xf32, #tpu.memory_space<vmem>>) attributes {dimension_semantics = [#tpu.dimension_semantics<parallel>], iteration_bounds = array<i64: 1>, scalar_prefetch = 0 : i64, scratch_operands = 0 : i64, tpu.core_type = #tpu.core_type<tc>, window_params = [{transform_indices = @transform_0, window_bounds = array<i64: 16, 32>}, {pipeline_mode = #tpu.pipeline_mode<synchronous>, transform_indices = @transform_1, window_bounds = array<i64: 32, 128>}, {pipeline_mode = #tpu.pipeline_mode<synchronous>, transform_indices = @transform_2, window_bounds = array<i64: 1, 128>}, {pipeline_mode = #tpu.pipeline_mode<synchronous>, transform_indices = @transform_3, window_bounds = array<i64: 128, 128>}, {pipeline_mode = #tpu.pipeline_mode<synchronous>, transform_indices = @transform_4, window_bounds = array<i64: 1, 128>}, {transform_indices = @transform_5, window_bounds = array<i64: 16, 128>}]} {
    %c0 = arith.constant 0 : index
    %c0_0 = arith.constant 0 : index
    %0 = vector.load %arg1[%c0, %c0_0] : memref<16x32xbf16, #tpu.memory_space<vmem>>, vector<16x32xbf16>
    %c0_1 = arith.constant 0 : index
    %c0_2 = arith.constant 0 : index
    %1 = vector.load %arg2[%c0_1, %c0_2] : memref<32x128xbf16, #tpu.memory_space<vmem>>, vector<32x128xbf16>
    %cst = arith.constant dense<0.000000e+00> : vector<16x128xf32>
    %2 = tpu.matmul %0, %1, %cst {dimension_numbers = #tpu.dot_dimension_numbers<[1], [0], [0], [1], [0, 0, 1, 1], [], []>} : vector<16x32xbf16>, vector<32x128xbf16>, vector<16x128xf32> -> vector<16x128xf32>
    %c0_3 = arith.constant 0 : index
    %c0_4 = arith.constant 0 : index
    %3 = vector.load %arg3[%c0_3, %c0_4] : memref<1x128xf32, #tpu.memory_space<vmem>>, vector<1x128xf32>
    %4 = vector.broadcast %3 : vector<1x128xf32> to vector<16x128xf32>
    %5 = arith.addf %2, %4 : vector<16x128xf32>
    %cst_5 = arith.constant 0.000000e+00 : f32
    %6 = vector.broadcast %cst_5 : f32 to vector<16x128xf32>
    %7 = arith.maximumf %5, %6 : vector<16x128xf32>
    %8 = arith.truncf %7 : vector<16x128xf32> to vector<16x128xbf16>
    %c0_6 = arith.constant 0 : index
    %c0_7 = arith.constant 0 : index
    %9 = vector.load %arg4[%c0_6, %c0_7] : memref<128x128xbf16, #tpu.memory_space<vmem>>, vector<128x128xbf16>
    %cst_8 = arith.constant dense<0.000000e+00> : vector<16x128xf32>
    %10 = tpu.matmul %8, %9, %cst_8 {dimension_numbers = #tpu.dot_dimension_numbers<[1], [0], [0], [1], [0, 0, 1, 1], [], []>} : vector<16x128xbf16>, vector<128x128xbf16>, vector<16x128xf32> -> vector<16x128xf32>
    %c0_9 = arith.constant 0 : index
    %c0_10 = arith.constant 0 : index
    %11 = vector.load %arg5[%c0_9, %c0_10] : memref<1x128xf32, #tpu.memory_space<vmem>>, vector<1x128xf32>
    %12 = vector.broadcast %11 : vector<1x128xf32> to vector<16x128xf32>
    %13 = arith.addf %10, %12 : vector<16x128xf32>
    %c0_11 = arith.constant 0 : index
    %c0_12 = arith.constant 0 : index
    %14 = vector.load %arg6[%c0_11, %c0_12] : memref<16x128xf32, #tpu.memory_space<vmem>>, vector<16x128xf32>
    tpu.vector_store %arg6[%c0_11, %c0_12], %13 {strides = array<i32>} : memref<16x128xf32, #tpu.memory_space<vmem>>, vector<16x128xf32>,
    return
  }
  func.func @transform_0(%arg0: i32) -> (i32, i32) {
    %c0_i32 = arith.constant 0 : i32
    %c0_i32_0 = arith.constant 0 : i32
    return %arg0, %c0_i32 : i32, i32
  }
  func.func @transform_1(%arg0: i32) -> (i32, i32) {
    %c0_i32 = arith.constant 0 : i32
    %c0_i32_0 = arith.constant 0 : i32
    %c0_i32_1 = arith.constant 0 : i32
    return %c0_i32, %c0_i32_0 : i32, i32
  }
  func.func @transform_2(%arg0: i32) -> (i32, i32) {
    %c0_i32 = arith.constant 0 : i32
    %c0_i32_0 = arith.constant 0 : i32
    %c0_i32_1 = arith.constant 0 : i32
    return %c0_i32, %c0_i32_0 : i32, i32
  }
  func.func @transform_3(%arg0: i32) -> (i32, i32) {
    %c0_i32 = arith.constant 0 : i32
    %c0_i32_0 = arith.constant 0 : i32
    %c0_i32_1 = arith.constant 0 : i32
    return %c0_i32, %c0_i32_0 : i32, i32
  }
  func.func @transform_4(%arg0: i32) -> (i32, i32) {
    %c0_i32 = arith.constant 0 : i32
    %c0_i32_0 = arith.constant 0 : i32
    %c0_i32_1 = arith.constant 0 : i32
    return %c0_i32, %c0_i32_0 : i32, i32
  }
  func.func @transform_5(%arg0: i32) -> (i32, i32) {
    %c0_i32 = arith.constant 0 : i32
    %c0_i32_0 = arith.constant 0 : i32
    return %arg0, %c0_i32 : i32, i32
  }
}

</mosaic_0001>

<bundles_post_ra>
// kernel: neuralnet_forward.1
= control target key start
LH: loop header
LB: loop body
LE: loop exit
PB: predicated region body
PF: predicated region fallthrough
CT: control target
= control target key end

     0   :  { %s334_s0 = inlined_call_operand.vmem [shape: bf16[16,32], index: 0, kind: input, shape index: {}]   ;;  %s335_s1 = inlined_call_operand.vmem [shape: bf16[32,128], index: 1, kind: input, shape index: {}]   ;;  %s336_s2 = inlined_call_operand.vmem [shape: f32[1,128], index: 2, kind: input, shape index: {}]   ;;  %s337_s3 = inlined_call_operand.vmem [shape: bf16[128,128], index: 3, kind: input, shape index: {}]   ;;  %s338_s4 = inlined_call_operand.vmem [shape: f32[1,128], index: 4, kind: input, shape index: {}]   ;;  %s339_s5 = inlined_call_operand.hbm [shape: f32[16,128], index: 5, kind: output, shape index: {}]  }
   0x1   :  { %v219_v0 = vld [vmem:[%s335_s1 + $0x8] sm:$0xff]  ;;  %v227_v1 = vld [vmem:[%s337_s3 + $0x38] sm:$0xff]  ;;  %v218_v2 = vld [vmem:[%s335_s1] sm:$0xff] }
   0x2   :  { %59 = vmatpush.bf16.msra.mxu0 %v219_v0  ;;  %138 = vmatpush.bf16.msra.mxu1 %v227_v1  ;;  %v226_v3 = vld [vmem:[%s337_s3 + $0x30] sm:$0xff] }
   0x3   :  { %10 = vsyncpa [#allocation3], 0  ;;  %v217_v4 = vld [vmem:[%s334_s0] sm:$0xff]  ;;  %vm49_vm0 = vcmask 261120   ;;  %v225_v5 = vld [vmem:[%s337_s3 + $0x28] sm:$0xff]  ;;  %s260_s20 = smov 128  }
   0x4   :  { %v224_v6 = vld [vmem:[%s337_s3 + $0x20] sm:$0xff]  ;;  %v223_v7 = vld [vmem:[%s337_s3 + $0x18] sm:$0xff]  ;;  %v222_v8 = vld [vmem:[%s337_s3 + $0x10] sm:$0xff]  ;;  %s261_s21 = smov 8  }
   0x5   :  { %v221_v9 = vld [vmem:[%s337_s3 + $0x8] sm:$0xff]  ;;  %v220_v10 = vld [vmem:[%s337_s3] sm:$0xff]  ;;  %s259_s3 = smov [#allocation2]  }
   0x6   :  { %60 = vmatpush.bf16.msra.mxu0 %v218_v2  ;;  %139 = vmatpush.bf16.msra.mxu1 %v226_v3  ;;  %v231_v12 = vld [vmem:[%s336_s2] ss:$0 sm:$0xff]  ;;  %s158_s17 = sshll.u32 %s259_s3, 4  ;;  %s160_s2 = sshll.u32 %s339_s5, 4  ;;  %s159_s17 = int_to_ptr.vmem [resolvable:$true] %s158_s17  ;;  %s161_s2 = int_to_ptr.hbm [resolvable:$true] %s160_s2 }
   0x7   :  { %v232_v19 = vld [vmem:[%s338_s4] ss:$0 sm:$0xff] }
   0x9   :  { %184 = vmatmul.msk.bf16.vlgmr.msra.gmra.mxu0 %vm49_vm0, %v217_v4 }
   0xa   :  { %140 = vmatpush.bf16.msra.mxu1 %v225_v5 }
   0xe   :  { %141 = vmatpush.bf16.msra.mxu1 %v224_v6 }
  0x12   :  { %142 = vmatpush.bf16.msra.mxu1 %v223_v7 }
  0x16   :  { %143 = vmatpush.bf16.msra.mxu1 %v222_v8 }
  0x1a   :  { %144 = vmatpush.bf16.msra.mxu1 %v221_v9 }
  0x1e   :  { %145 = vmatpush.bf16.msra.mxu1 %v220_v10 }
  0x86   :  { %v62_v11 = vpop.f32.mrf.mxu0 }
  0x87   :  { %v63_v13 = vadd.f32 %v231_v12, %v62_v11 }
  0x89   :  { %v67_v16 = vmax.f32 %v63_v13, 0.0 }
  0x8e   :  { %v64_v14 = vpop.f32.mrf.mxu0 }
  0x8f   :  { %v65_v15 = vadd.f32 %v231_v12, %v64_v14 }
  0x91   :  { %v68_v17 = vmax.f32 %v65_v15, 0.0 }
  0x93   :  { %v69_v18 = vpack.c.bf16 %v68_v17, %v67_v16 }
  0x95   :  { %146 = vmatmul.bf16.vlgmr.msra.gmra.mxu1 %v69_v18 }
 0x112   :  { %v147_v20 = vpop.f32.mrf.mxu1 }
 0x113   :  { %v148_v21 = vadd.f32 %v232_v19, %v147_v20 }
 0x115   :  { %152 = vst [vmem:[#allocation2] sm:$0xff] %v148_v21 }
 0x11a   :  { %v149_v22 = vpop.f32.mrf.mxu1 }
 0x11b   :  { %v150_v23 = vadd.f32 %v232_v19, %v149_v22 }
 0x11d   :  { %153 = vst [vmem:[#allocation2 + $0x8] sm:$0xff] %v150_v23 }
 0x11e   :  { %166 = dma.vmem_to_hbm [thread:$0]  %s159_s17, 256, %s161_s2, [#allocation3], %s260_s20, %s260_s20, %s261_s21  }
 0x11f   :  { %257 = dma.done.wait [#allocation3], 256  }
 0x120   :  { %258 = vsyncadd [#allocation3], 4294967040 }
 0x121   :  { %171 = vsyncpa [#allocation3], 1 }

</bundles_post_ra>
